<compile_context>
chip_gen: v7x
topology: tpu7x:2x2x1
jax: 0.10.0
libtpu: 0.0.40
codegen_flags: <defaults>
</compile_context>

<pallas_src>
import numpy as np
import jax
import jax.numpy as jnp
from jax import lax
from jax.experimental import pallas as pl
from jax.experimental.pallas import tpu as pltpu


def inter_kernel(starts_ref, ends_ref, idx_ref, emb_ref, w1_ref, b1_ref, w2_ref, b2_ref,
                 out_ref):
    """Fully vectorized EmbeddingBag(sum) + ReLU + two Linear+ReLU layers.

    starts_ref: VMEM int32 [B, 1]  - offsets[:-1]
    ends_ref:   VMEM int32 [B, 1]  - offsets[1:]   (include_last_offset=True)
    idx_ref:    VMEM int32 [N, 1]  - flat bag indices
    emb_ref:    VMEM f32   [V, H]  - embedding table
    w1/w2:      VMEM f32   [H, H]  - linear weights (pre-transposed, x @ W)
    b1/b2:      VMEM f32   [1, H]  - biases
    out_ref:    VMEM f32   [B, H]
    """
    B, H = out_ref.shape
    N = idx_ref.shape[0]
    V = emb_ref.shape[0]

    # --- EmbeddingBag(mode='sum') as two MXU matmuls --------------------------------
    # seg_mask[b, j] = 1 iff offsets[b] <= j < offsets[b+1]
    col = lax.broadcasted_iota(jnp.int32, (B, N), 1)                       # [B, N]
    seg_mask = jnp.logical_and(col >= starts_ref[...],
                               col < ends_ref[...]).astype(jnp.float32)    # [B, N]

    # onehot[j, v] = 1 iff indices[j] == v
    vcol = lax.broadcasted_iota(jnp.int32, (N, V), 1)                      # [N, V]
    onehot = (vcol == idx_ref[...]).astype(jnp.float32)                    # [N, V]

    counts = jnp.dot(seg_mask, onehot, preferred_element_type=jnp.float32)  # [B, V]
    bag = jnp.dot(counts, emb_ref[...], preferred_element_type=jnp.float32)  # [B, H]

    # --- ReLU + linear stack (Dropout(0.3) is identity at inference) ----------------
    x = jnp.maximum(bag, 0.0)
    h = jnp.maximum(
        jnp.dot(x, w1_ref[...], preferred_element_type=jnp.float32) + b1_ref[...], 0.0)
    out_ref[...] = jnp.maximum(
        jnp.dot(h, w2_ref[...], preferred_element_type=jnp.float32) + b2_ref[...], 0.0)


def inter_model_forward(indices, offsets, emb, w1, b1, w2, b2):
    B = offsets.shape[0] - 1
    N = indices.shape[0]
    V, H = emb.shape

    # Layout plumbing in the wrapper: present offsets as per-bag [start, end] columns and
    # indices as an [N, 1] column so the kernel can broadcast-compare against 2-D iotas.
    offsets = offsets.astype(jnp.int32)
    starts = offsets[:-1].reshape(B, 1)
    ends = offsets[1:].reshape(B, 1)
    idx2d = indices.astype(jnp.int32).reshape(N, 1)

    # Advisory cost estimate so XLA schedules/overlaps the custom call sensibly.
    flops = 2 * (B * N * V + B * V * H + 2 * B * H * H)
    bytes_accessed = 4 * (V * H + 2 * H * H + 2 * H + B * H + N + 2 * B)
    cost = pl.CostEstimate(flops=flops, transcendentals=0,
                           bytes_accessed=bytes_accessed)

    return pl.pallas_call(
        inter_kernel,
        out_shape=jax.ShapeDtypeStruct((B, H), jnp.float32),
        in_specs=[
            pl.BlockSpec(memory_space=pltpu.MemorySpace.VMEM),  # starts
            pl.BlockSpec(memory_space=pltpu.MemorySpace.VMEM),  # ends
            pl.BlockSpec(memory_space=pltpu.MemorySpace.VMEM),  # indices
            pl.BlockSpec(memory_space=pltpu.MemorySpace.VMEM),  # embedding table
            pl.BlockSpec(memory_space=pltpu.MemorySpace.VMEM),  # w1
            pl.BlockSpec(memory_space=pltpu.MemorySpace.VMEM),  # b1
            pl.BlockSpec(memory_space=pltpu.MemorySpace.VMEM),  # w2
            pl.BlockSpec(memory_space=pltpu.MemorySpace.VMEM),  # b2
        ],
        out_specs=pl.BlockSpec(memory_space=pltpu.MemorySpace.VMEM),
        compiler_params=pltpu.CompilerParams(vmem_limit_bytes=32 * 1024 * 1024),
        cost_estimate=cost,
    )(starts, ends, idx2d, emb, w1, b1, w2, b2)


def reference_forward(indices, offsets, emb, w1, b1, w2, b2):
    """Pure numpy reference matching PyTorch semantics (eval mode)."""
    indices = np.asarray(indices)
    offsets = np.asarray(offsets)
    emb = np.asarray(emb)
    B = offsets.shape[0] - 1
    H = emb.shape[1]
    bags = np.zeros((B, H), np.float32)
    for b in range(B):
        for j in range(offsets[b], offsets[b + 1]):
            bags[b] += emb[indices[j]]
    x = np.maximum(bags, 0.0)
    h = np.maximum(x @ np.asarray(w1) + np.asarray(b1), 0.0)
    h = np.maximum(h @ np.asarray(w2) + np.asarray(b2), 0.0)
    return h


if __name__ == "__main__":
    # Small, deterministic problem: vocab V=64, hidden H=128, batch B=8, N=24 indices.
    V, H, B, N = 64, 128, 8, 24

    key = jax.random.PRNGKey(0)
    k_idx, k_emb, k_w1, k_b1, k_w2, k_b2 = jax.random.split(key, 6)

    indices = jax.random.randint(k_idx, (N,), 0, V, dtype=jnp.int32)
    # include_last_offset=True: offsets has B+1 entries, last one == N.
    # Uneven bags (including one empty bag) to exercise the segment mask properly.
    offsets = jnp.asarray([0, 2, 5, 5, 9, 14, 17, 20, 24], dtype=jnp.int32)

    emb = jax.random.normal(k_emb, (V, H), dtype=jnp.float32)
    w1 = jax.random.normal(k_w1, (H, H), dtype=jnp.float32) * 0.05
    b1 = jax.random.normal(k_b1, (1, H), dtype=jnp.float32) * 0.05
    w2 = jax.random.normal(k_w2, (H, H), dtype=jnp.float32) * 0.05
    b2 = jax.random.normal(k_b2, (1, H), dtype=jnp.float32) * 0.05

    out = inter_model_forward(indices, offsets, emb, w1, b1, w2, b2)
    out = jax.block_until_ready(out)

    ref = reference_forward(indices, offsets, emb, w1, b1, w2, b2)
    np.testing.assert_allclose(np.asarray(out), ref, rtol=1e-5, atol=1e-5)

    print("KERNEL_OK")
</pallas_src>

<mosaic_0001>
module attributes {stable_mosaic.version = 11 : i64} {
  func.func @inter_kernel(%arg0: memref<8x1xi32, #tpu.memory_space<vmem>>, %arg1: memref<8x1xi32, #tpu.memory_space<vmem>>, %arg2: memref<24x1xi32, #tpu.memory_space<vmem>>, %arg3: memref<64x128xf32, #tpu.memory_space<vmem>>, %arg4: memref<128x128xf32, #tpu.memory_space<vmem>>, %arg5: memref<1x128xf32, #tpu.memory_space<vmem>>, %arg6: memref<128x128xf32, #tpu.memory_space<vmem>>, %arg7: memref<1x128xf32, #tpu.memory_space<vmem>>, %arg8: memref<8x128xf32, #tpu.memory_space<vmem>>) attributes {dimension_semantics = [], scalar_prefetch = 0 : i64, scratch_operands = 0 : i64, tpu.core_type = #tpu.core_type<tc>} {
    %0 = tpu.iota {dimensions = array<i32: 1>} : vector<8x24xi32>
    %c0 = arith.constant 0 : index
    %c0_0 = arith.constant 0 : index
    %1 = vector.load %arg0[%c0, %c0_0] : memref<8x1xi32, #tpu.memory_space<vmem>>, vector<8x1xi32>
    %2 = vector.broadcast %1 : vector<8x1xi32> to vector<8x24xi32>
    %3 = arith.cmpi sge, %0, %2 : vector<8x24xi32>
    %c0_1 = arith.constant 0 : index
    %c0_2 = arith.constant 0 : index
    %4 = vector.load %arg1[%c0_1, %c0_2] : memref<8x1xi32, #tpu.memory_space<vmem>>, vector<8x1xi32>
    %5 = vector.broadcast %4 : vector<8x1xi32> to vector<8x24xi32>
    %6 = arith.cmpi slt, %0, %5 : vector<8x24xi32>
    %7 = arith.andi %3, %6 : vector<8x24xi1>
    %8 = arith.extui %7 : vector<8x24xi1> to vector<8x24xi32>
    %9 = arith.sitofp %8 : vector<8x24xi32> to vector<8x24xf32>
    %10 = tpu.iota {dimensions = array<i32: 1>} : vector<24x64xi32>
    %c0_3 = arith.constant 0 : index
    %c0_4 = arith.constant 0 : index
    %11 = vector.load %arg2[%c0_3, %c0_4] : memref<24x1xi32, #tpu.memory_space<vmem>>, vector<24x1xi32>
    %12 = vector.broadcast %11 : vector<24x1xi32> to vector<24x64xi32>
    %13 = arith.cmpi eq, %10, %12 : vector<24x64xi32>
    %14 = arith.extui %13 : vector<24x64xi1> to vector<24x64xi32>
    %15 = arith.sitofp %14 : vector<24x64xi32> to vector<24x64xf32>
    %cst = arith.constant dense<0.000000e+00> : vector<8x64xf32>
    %16 = tpu.matmul %9, %15, %cst {dimension_numbers = #tpu.dot_dimension_numbers<[1], [0], [0], [1], [0, 0, 1, 1], [], []>} : vector<8x24xf32>, vector<24x64xf32>, vector<8x64xf32> -> vector<8x64xf32>
    %c0_5 = arith.constant 0 : index
    %c0_6 = arith.constant 0 : index
    %17 = vector.load %arg3[%c0_5, %c0_6] : memref<64x128xf32, #tpu.memory_space<vmem>>, vector<64x128xf32>
    %cst_7 = arith.constant dense<0.000000e+00> : vector<8x128xf32>
    %18 = tpu.matmul %16, %17, %cst_7 {dimension_numbers = #tpu.dot_dimension_numbers<[1], [0], [0], [1], [0, 0, 1, 1], [], []>} : vector<8x64xf32>, vector<64x128xf32>, vector<8x128xf32> -> vector<8x128xf32>
    %cst_8 = arith.constant 0.000000e+00 : f32
    %19 = vector.broadcast %cst_8 : f32 to vector<8x128xf32>
    %20 = arith.maximumf %18, %19 : vector<8x128xf32>
    %c0_9 = arith.constant 0 : index
    %c0_10 = arith.constant 0 : index
    %21 = vector.load %arg4[%c0_9, %c0_10] : memref<128x128xf32, #tpu.memory_space<vmem>>, vector<128x128xf32>
    %cst_11 = arith.constant dense<0.000000e+00> : vector<8x128xf32>
    %22 = tpu.matmul %20, %21, %cst_11 {dimension_numbers = #tpu.dot_dimension_numbers<[1], [0], [0], [1], [0, 0, 1, 1], [], []>} : vector<8x128xf32>, vector<128x128xf32>, vector<8x128xf32> -> vector<8x128xf32>
    %c0_12 = arith.constant 0 : index
    %c0_13 = arith.constant 0 : index
    %23 = vector.load %arg5[%c0_12, %c0_13] : memref<1x128xf32, #tpu.memory_space<vmem>>, vector<1x128xf32>
    %24 = vector.broadcast %23 : vector<1x128xf32> to vector<8x128xf32>
    %25 = arith.addf %22, %24 : vector<8x128xf32>
    %cst_14 = arith.constant 0.000000e+00 : f32
    %26 = vector.broadcast %cst_14 : f32 to vector<8x128xf32>
    %27 = arith.maximumf %25, %26 : vector<8x128xf32>
    %c0_15 = arith.constant 0 : index
    %c0_16 = arith.constant 0 : index
    %28 = vector.load %arg6[%c0_15, %c0_16] : memref<128x128xf32, #tpu.memory_space<vmem>>, vector<128x128xf32>
    %cst_17 = arith.constant dense<0.000000e+00> : vector<8x128xf32>
    %29 = tpu.matmul %27, %28, %cst_17 {dimension_numbers = #tpu.dot_dimension_numbers<[1], [0], [0], [1], [0, 0, 1, 1], [], []>} : vector<8x128xf32>, vector<128x128xf32>, vector<8x128xf32> -> vector<8x128xf32>
    %c0_18 = arith.constant 0 : index
    %c0_19 = arith.constant 0 : index
    %30 = vector.load %arg7[%c0_18, %c0_19] : memref<1x128xf32, #tpu.memory_space<vmem>>, vector<1x128xf32>
    %31 = vector.broadcast %30 : vector<1x128xf32> to vector<8x128xf32>
    %32 = arith.addf %29, %31 : vector<8x128xf32>
    %cst_20 = arith.constant 0.000000e+00 : f32
    %33 = vector.broadcast %cst_20 : f32 to vector<8x128xf32>
    %34 = arith.maximumf %32, %33 : vector<8x128xf32>
    %c0_21 = arith.constant 0 : index
    %c0_22 = arith.constant 0 : index
    %35 = vector.load %arg8[%c0_21, %c0_22] : memref<8x128xf32, #tpu.memory_space<vmem>>, vector<8x128xf32>
    tpu.vector_store %arg8[%c0_21, %c0_22], %34 {strides = array<i32>} : memref<8x128xf32, #tpu.memory_space<vmem>>, vector<8x128xf32>,
    return
  }
}

</mosaic_0001>

<bundles_post_ra>
// kernel: tpu_custom_call.1
= control target key start
LH: loop header
LB: loop body
LE: loop exit
PB: predicated region body
PF: predicated region fallthrough
CT: control target
= control target key end

     0   :  { %13 = vsyncpa [#allocation3], 0  ;;  %s969_s0 = inlined_call_operand.vmem [shape: s32[8,1], index: 0, kind: input, shape index: {}]   ;;  %s970_s1 = inlined_call_operand.vmem [shape: s32[8,1], index: 1, kind: input, shape index: {}]   ;;  %s971_s2 = inlined_call_operand.vmem [shape: s32[24,1], index: 2, kind: input, shape index: {}]   ;;  %s972_s3 = inlined_call_operand.hbm [shape: f32[64,128], index: 3, kind: input, shape index: {}]   ;;  %s973_s4 = inlined_call_operand.hbm [shape: f32[128,128], index: 4, kind: input, shape index: {}]   ;;  %s974_s5 = inlined_call_operand.vmem [shape: f32[1,128], index: 5, kind: input, shape index: {}]   ;;  %s975_s6 = inlined_call_operand.hbm [shape: f32[128,128], index: 6, kind: input, shape index: {}]   ;;  %s976_s7 = inlined_call_operand.vmem [shape: f32[1,128], index: 7, kind: input, shape index: {}]   ;;  %s977_s8 = inlined_call_operand.hbm [shape: f32[8,128], index: 8, kind: output, shape index: {}]  }
   0x1   :  { %14 = vsyncpa [#allocation6], 0 }
   0x2   :  { %15 = vsyncpa [#allocation4], 0  ;;  %s796_s27 = smov [#allocation5]   ;;  %s797_s29 = smov [#allocation2]  }
   0x3   :  { %s39_s28 = sshll.u32 %s796_s27, 4  ;;  %s27_s30 = sshll.u32 %s797_s29, 4  ;;  %s40_s28 = int_to_ptr.vmem [resolvable:$true] %s39_s28  ;;  %s853_s30 = int_to_ptr.vmem [resolvable:$true] %s27_s30 }
   0x4   :  { %s702_s11 = scalar_lea.hbm %s973_s4, 2048 }
   0x5   :  { %p703_p0 = scmp.ne.s32.totalorder %s973_s4, %s702_s11  ;;  %p706_p1 = scmp.lt.u32.totalorder %s702_s11, %s973_s4 }
   0x7   :  { %p708_p2 = pnand %p706_p1, %p703_p0 }
   0x9   :  { %711 = shalt.err (!%p708_p2)
}
   0xa   :  { %s712_s16 = scalar_lea.vmem %s40_s28, 2048  ;;  %p717_p4 = scmp.lt.s32.totalorder %s40_s28, %s40_s28 }
   0xb   :  { %p713_p3 = scmp.ne.s32.totalorder %s40_s28, %s712_s16  ;;  %p718_p5 = scmp.lt.s32.totalorder %s712_s16, %s712_s16 }
   0xd   :  { %p719_p6 = por %p718_p5, %p717_p4 }
   0xf   :  { %p720_p7 = pnand %p719_p6, %p713_p3 }
  0x11   :  { %723 = shalt.err (!%p720_p7)
}
  0x12   :  { %s798_s17 = smov 128   ;;  %s799_s18 = smov 8  }
  0x13   :  { %45 = dma.hbm_to_vmem [thread:$0]  %s973_s4, 2048, %s40_s28, [#allocation6], %s798_s17, %s798_s17, %s799_s18  }
  0x14   :  { %s724_s23 = scalar_lea.hbm %s972_s3, 1024 }
  0x15   :  { %p725_p8 = scmp.ne.s32.totalorder %s972_s3, %s724_s23  ;;  %p728_p9 = scmp.lt.u32.totalorder %s724_s23, %s972_s3 }
  0x17   :  { %p730_p10 = pnand %p728_p9, %p725_p8 }
  0x19   :  { %733 = shalt.err (!%p730_p10)
}
  0x1a   :  { %s734_s29 = scalar_lea.vmem %s853_s30, 1024  ;;  %p739_p12 = scmp.lt.s32.totalorder %s853_s30, %s853_s30 }
  0x1b   :  { %p735_p11 = scmp.ne.s32.totalorder %s853_s30, %s734_s29  ;;  %p740_p13 = scmp.lt.s32.totalorder %s734_s29, %s734_s29 }
  0x1d   :  { %p741_p0 = por %p740_p13, %p739_p12 }
  0x1f   :  { %p742_p1 = pnand %p741_p0, %p735_p11 }
  0x21   :  { %745 = shalt.err (!%p742_p1)
}
  0x22   :  { %33 = dma.hbm_to_vmem [thread:$0]  %s972_s3, 1024, %s853_s30, [#allocation3], %s798_s17, %s798_s17, %s799_s18  }
  0x23   :  { %s800_s9 = smov [#allocation7]   ;;  %s746_s13 = scalar_lea.hbm %s975_s6, 2048 }
  0x24   :  { %s53_s10 = sshll.u32 %s800_s9, 4  ;;  %p747_p2 = scmp.ne.s32.totalorder %s975_s6, %s746_s13  ;;  %s54_s10 = int_to_ptr.vmem [resolvable:$true] %s53_s10 }
  0x25   :  { %p750_p3 = scmp.lt.u32.totalorder %s746_s13, %s975_s6 }
  0x27   :  { %p752_p4 = pnand %p750_p3, %p747_p2 }
  0x29   :  { %755 = shalt.err (!%p752_p4)
}
  0x2a   :  { %s756_s20 = scalar_lea.vmem %s54_s10, 2048  ;;  %p761_p6 = scmp.lt.s32.totalorder %s54_s10, %s54_s10 }
  0x2b   :  { %p757_p5 = scmp.ne.s32.totalorder %s54_s10, %s756_s20  ;;  %p762_p7 = scmp.lt.s32.totalorder %s756_s20, %s756_s20 }
  0x2d   :  { %p763_p8 = por %p762_p7, %p761_p6 }
  0x2f   :  { %p764_p9 = pnand %p763_p8, %p757_p5 }
  0x31   :  { %767 = shalt.err (!%p764_p9)
}
  0x32   :  { %59 = dma.hbm_to_vmem [thread:$0]  %s975_s6, 2048, %s54_s10, [#allocation6], %s798_s17, %s798_s17, %s799_s18  }
  0x33   :  { %790 = dma.done.wait [#allocation3], 1024  }
  0x34   :  { %791 = vsyncadd [#allocation3], 4294966272 }
  0x35   :  { %792 = dma.done.wait [#allocation6], 4096  }
  0x36   :  { %793 = vsyncadd [#allocation6], 4294963200  ;;  %v801_v0 = vmov 0   ;;  %v86_v1 = vld [vmem:[%s971_s2] sm:$0xff]  ;;  %v87_v3 = vld [vmem:[%s971_s2 + $0x8] sm:$0xff]  ;;  %v802_v6 = vmov 0.0|0.0   ;;  %v71_v20 = vlaneseq }
  0x37   :  { %701 = vset.pattern.permute.xlu1 %v801_v0  ;;  %700 = vset.pattern.permute.xlu0 %v801_v0  ;;  %v73_v2 = vld [vmem:[%s969_s0] sm:$0xff]  ;;  %v88_v5 = vld [vmem:[%s971_s2 + $0x10] sm:$0xff]  ;;  %vm803_vm0 = vmmov 0   ;;  %v804_v7 = vmov 0.0   ;;  %v181_v8 = vld [vmem:[#allocation2] sm:$0xff]  ;;  %vm107_vm8 = vcmask 195584  }
  0x38   :  { %90 = vperm.xlu0 %700, %v86_v1   ;;  %75 = vperm.xlu1 %701, %v73_v2   ;;  %v78_v4 = vld [vmem:[%s970_s1] sm:$0xff]  ;;  %v182_v9 = vld [vmem:[#allocation2 + $0x8] sm:$0xff]  ;;  %v183_v10 = vld [vmem:[#allocation2 + $0x10] sm:$0xff]  ;;  %v72_v23 = vand.u32 127, %v71_v20  ;;  %v805_v26 = vmov 1.0|1.0  }
  0x39   :  { %625 = vmatprep.subr.bf16.mxu0 %v802_v6  ;;  %628 = vmatprep.subr.bf16.mxu1 %v802_v6  ;;  %v629_v11 = vpack.c.bf16 %v182_v9, %v181_v8  ;;  %v184_v12 = vld [vmem:[#allocation2 + $0x18] sm:$0xff]  ;;  %v185_v14 = vld [vmem:[#allocation2 + $0x20] sm:$0xff]  ;;  %v186_v15 = vld [vmem:[#allocation2 + $0x28] sm:$0xff]  ;;  %v806_v29 = vmov 1.0   ;;  %vm189_vm9 = vcmask 523264   ;;  %s807_s4 = smov [#allocation8]  }
  0x3a   :  { %533 = vmatprep.mubr.msk.f32.mxu0 %vm803_vm0, %v804_v7  ;;  %552 = vmatprep.mubr.msk.f32.mxu1 %vm803_vm0, %v804_v7  ;;  %v632_v13 = vpack.c.bf16 %v184_v12, %v183_v10  ;;  %v635_v16 = vpack.c.bf16 %v186_v15, %v185_v14  ;;  %v187_v17 = vld [vmem:[#allocation2 + $0x30] sm:$0xff]  ;;  %v188_v18 = vld [vmem:[#allocation2 + $0x38] sm:$0xff]  ;;  %v264_v30 = vld [vmem:[#allocation5] sm:$0xff]  ;;  %s459_s28 = sshll.u32 %s807_s4, 4  ;;  %s460_s28 = int_to_ptr.vmem [resolvable:$true] %s459_s28 }
  0x3b   :  { %630 = vmatpush3.bf16.msra.mxu1 %v629_v11  ;;  %v638_v19 = vpack.c.bf16 %v188_v18, %v187_v17  ;;  %v265_v31 = vld [vmem:[#allocation5 + $0x8] sm:$0xff]  ;;  %v266_v32 = vld [vmem:[#allocation5 + $0x10] sm:$0xff]  ;;  %v267_v34 = vld [vmem:[#allocation5 + $0x18] sm:$0xff]  ;;  %s768_s9 = scalar_lea.vmem %s460_s28, 128  ;;  %p773_p11 = scmp.lt.s32.totalorder %s460_s28, %s460_s28 }
  0x3c   :  { %93 = vperm.xlu0 %700, %v87_v3   ;;  %80 = vperm.xlu1 %701, %v78_v4   ;;  %v641_v33 = vpack.c.bf16 %v265_v31, %v264_v30  ;;  %v644_v35 = vpack.c.bf16 %v267_v34, %v266_v32  ;;  %v268_v36 = vld [vmem:[#allocation5 + $0x20] sm:$0xff]  ;;  %v269_v37 = vld [vmem:[#allocation5 + $0x28] sm:$0xff]  ;;  %v270_v39 = vld [vmem:[#allocation5 + $0x30] sm:$0xff]  ;;  %p769_p10 = scmp.ne.s32.totalorder %s460_s28, %s768_s9  ;;  %p774_p12 = scmp.lt.s32.totalorder %s768_s9, %s768_s9 }
  0x3d   :  { %631 = vmatprep.subr.bf16.mxu1 %v802_v6  ;;  %v647_v38 = vpack.c.bf16 %v269_v37, %v268_v36  ;;  %v271_v40 = vld [vmem:[#allocation5 + $0x38] sm:$0xff]  ;;  %v272_v42 = vld [vmem:[#allocation5 + $0x40] sm:$0xff]  ;;  %v273_v43 = vld [vmem:[#allocation5 + $0x48] sm:$0xff] }
  0x3e   :  { %v650_v41 = vpack.c.bf16 %v271_v40, %v270_v39  ;;  %v653_v44 = vpack.c.bf16 %v273_v43, %v272_v42  ;;  %v274_v45 = vld [vmem:[#allocation5 + $0x50] sm:$0xff]  ;;  %v275_v46 = vld [vmem:[#allocation5 + $0x58] sm:$0xff]  ;;  %v276_v48 = vld [vmem:[#allocation5 + $0x60] sm:$0xff]  ;;  %p775_p13 = por %p774_p12, %p773_p11 }
  0x3f   :  { %633 = vmatpush3.bf16.msra.mxu1 %v632_v13  ;;  %v656_v47 = vpack.c.bf16 %v275_v46, %v274_v45  ;;  %v277_v49 = vld [vmem:[#allocation5 + $0x68] sm:$0xff]  ;;  %v278_v53 = vld [vmem:[#allocation5 + $0x70] sm:$0xff]  ;;  %v279_v54 = vld [vmem:[#allocation5 + $0x78] sm:$0xff] }
  0x40   :  { %96 = vperm.xlu0 %700, %v88_v5   ;;  %634 = vmatprep.subr.bf16.mxu1 %v802_v6  ;;  %v659_v50 = vpack.c.bf16 %v277_v49, %v276_v48  ;;  %v662_v55 = vpack.c.bf16 %v279_v54, %v278_v53  ;;  %v358_v56 = vld [vmem:[#allocation7] sm:$0xff]  ;;  %v359_v57 = vld [vmem:[#allocation7 + $0x8] sm:$0xff]  ;;  %v360_v58 = vld [vmem:[#allocation7 + $0x10] sm:$0xff]  ;;  %p776_p0 = pnand %p775_p13, %p769_p10 }
  0x41   :  { %v665_v59 = vpack.c.bf16 %v359_v57, %v358_v56  ;;  %v361_v60 = vld [vmem:[#allocation7 + $0x18] sm:$0xff]  ;;  %v362_v62 = vld [vmem:[#allocation7 + $0x20] sm:$0xff]  ;;  %v363_v63 = vld [vmem:[#allocation7 + $0x28] sm:$0xff] }
  0x42   :  { %v668_v61 = vpack.c.bf16 %v361_v60, %v360_v58  ;;  %v671_v0 = vpack.c.bf16 %v363_v63, %v362_v62  ;;  %v364_v1 = vld [vmem:[#allocation7 + $0x30] sm:$0xff]  ;;  %v365_v2 = vld [vmem:[#allocation7 + $0x38] sm:$0xff]  ;;  %v366_v4 = vld [vmem:[#allocation7 + $0x40] sm:$0xff] }
  0x43   :  { %636 = vmatpush3.bf16.msra.mxu1 %v635_v16  ;;  %v674_v3 = vpack.c.bf16 %v365_v2, %v364_v1  ;;  %v367_v5 = vld [vmem:[#allocation7 + $0x48] sm:$0xff]  ;;  %v368_v8 = vld [vmem:[#allocation7 + $0x50] sm:$0xff]  ;;  %v369_v9 = vld [vmem:[#allocation7 + $0x58] sm:$0xff] }
  0x44   :  { %637 = vmatprep.subr.bf16.mxu1 %v802_v6  ;;  %v680_v10 = vpack.c.bf16 %v369_v9, %v368_v8  ;;  %v370_v11 = vld [vmem:[#allocation7 + $0x60] sm:$0xff]  ;;  %v371_v12 = vld [vmem:[#allocation7 + $0x68] sm:$0xff]  ;;  %v372_v17 = vld [vmem:[#allocation7 + $0x70] sm:$0xff] }
  0x45   :  { %v683_v13 = vpack.c.bf16 %v371_v12, %v370_v11  ;;  %v373_v18 = vld [vmem:[#allocation7 + $0x78] sm:$0xff] }
  0x46   :  { %v478_v20 = vld [vmem:[%s974_s5] ss:$0 sm:$0xff] }
  0x47   :  { %639 = vmatpush3.bf16.msra.mxu1 %v638_v19  ;;  %v686_v19 = vpack.c.bf16 %v373_v18, %v372_v17 }
  0x48   :  { %664 = vmatprep.subr.bf16.mxu1 %v802_v6 }
  0xb7   :  { %v91_v21 = vpop.permute.xlu0 %90  ;;  %v76_v22 = vpop.permute.xlu1 %75 }
  0xb8   :  { %vm98_vm1 = vcmp.eq.s32.totalorder %v72_v23, %v91_v21  ;;  %vm77_vm2 = vcmp.ge.s32.totalorder %v72_v23, %v76_v22 }
  0xbb   :  { %v94_v24 = vpop.permute.xlu0 %93  ;;  %v81_v25 = vpop.permute.xlu1 %80 }
  0xbc   :  { %vm99_vm3 = vcmp.eq.s32.totalorder %v72_v23, %v94_v24  ;;  %vm82_vm4 = vcmp.lt.s32.totalorder %v72_v23, %v81_v25 }
  0xbd   :  { %vm626_vm5 = vmpackc.low %vm99_vm3, %vm98_vm1 }
  0xbe   :  { %627 = vmatpush3.bf16.msk.msra.mxu0 %vm626_vm5, %v805_v26  ;;  %vm83_vm6 = vmand %vm77_vm2, %vm82_vm4 }
  0xbf   :  { %v97_v27 = vpop.permute.xlu0 %96  ;;  %531 = vmatprep.subr.mxu0 %v804_v7  ;;  %v469_v28 = vsel %vm83_vm6, 1.0, %v804_v7 }
  0xc0   :  { %vm100_vm7 = vcmp.eq.s32.totalorder %v72_v23, %v97_v27 }
  0xc2   :  { %532 = vmatpush3.msk.msra.mxu0 %vm100_vm7, %v806_v29 }
  0xc3   :  { %534 = vmatmul.mubr.msk.f32.vlgmr.msra.gmra.mrb[0].mxu0 %vm107_vm8, %v469_v28  ;;  %640 = vmatprep.subr.bf16.mxu0 %v802_v6 }
  0xc4   :  { %587 = vmatprep.mubr.msk.f32.mxu0 %vm803_vm0, %v804_v7  ;;  %642 = vmatpush3.bf16.msra.mxu0 %v641_v33 }
  0xc5   :  { %643 = vmatprep.subr.bf16.mxu0 %v802_v6 }
  0xc8   :  { %645 = vmatpush3.bf16.msra.mxu0 %v644_v35 }
  0xc9   :  { %646 = vmatprep.subr.bf16.mxu0 %v802_v6 }
  0xcc   :  { %648 = vmatpush3.bf16.msra.mxu0 %v647_v38 }
  0xcd   :  { %649 = vmatprep.subr.bf16.mxu0 %v802_v6 }
  0xd0   :  { %651 = vmatpush3.bf16.msra.mxu0 %v650_v41 }
  0xd1   :  { %652 = vmatprep.subr.bf16.mxu0 %v802_v6 }
  0xd4   :  { %654 = vmatpush3.bf16.msra.mxu0 %v653_v44 }
  0xd5   :  { %655 = vmatprep.subr.bf16.mxu0 %v802_v6 }
  0xd8   :  { %657 = vmatpush3.bf16.msra.mxu0 %v656_v47 }
  0xd9   :  { %658 = vmatprep.subr.bf16.mxu0 %v802_v6 }
  0xdc   :  { %660 = vmatpush3.bf16.msra.mxu0 %v659_v50 }
  0xdd   :  { %661 = vmatprep.subr.bf16.mxu0 %v802_v6 }
  0xe0   :  { %663 = vmatpush3.bf16.msra.mxu0 %v662_v55 }
 0x196   :  { %v177_v51 = vpop.f32.mrb[0].mxu0 }
 0x197   :  { %v535_v52 = vpop.f32.mrb[1].mxu0  ;;  %553 = vmatmul.mubr.msk.f32.vlgmr.msra.gmra.mrb[0].mxu1 %vm189_vm9, %v177_v51 }
 0x198   :  { %622 = vmatprep.mubr.msk.f32.mxu1 %vm803_vm0, %v804_v7  ;;  %666 = vmatpush3.bf16.msra.mxu1 %v665_v59  ;;  %v677_v7 = vpack.c.bf16 %v367_v5, %v366_v4 }
 0x199   :  { %667 = vmatprep.subr.bf16.mxu1 %v802_v6 }
 0x19c   :  { %669 = vmatpush3.bf16.msra.mxu1 %v668_v61 }
 0x19d   :  { %670 = vmatprep.subr.bf16.mxu1 %v802_v6 }
 0x1a0   :  { %672 = vmatpush3.bf16.msra.mxu1 %v671_v0 }
 0x1a1   :  { %673 = vmatprep.subr.bf16.mxu1 %v802_v6 }
 0x1a4   :  { %675 = vmatpush3.bf16.msra.mxu1 %v674_v3 }
 0x1a5   :  { %676 = vmatprep.subr.bf16.mxu1 %v802_v6 }
 0x1a8   :  { %678 = vmatpush3.bf16.msra.mxu1 %v677_v7 }
 0x1a9   :  { %679 = vmatprep.subr.bf16.mxu1 %v802_v6 }
 0x1ac   :  { %681 = vmatpush3.bf16.msra.mxu1 %v680_v10 }
 0x1ad   :  { %682 = vmatprep.subr.bf16.mxu1 %v802_v6 }
 0x1b0   :  { %684 = vmatpush3.bf16.msra.mxu1 %v683_v13 }
 0x1b1   :  { %685 = vmatprep.subr.bf16.mxu1 %v802_v6  ;;  %v479_v6 = vld [vmem:[%s976_s7] ss:$0 sm:$0xff] }
 0x1b4   :  { %687 = vmatpush3.bf16.msra.mxu1 %v686_v19 }
 0x26a   :  { %v259_v14 = vpop.f32.mrb[0].mxu1 }
 0x26b   :  { %v263_v15 = vmax.f32 %v259_v14, 0.0  ;;  %v554_v16 = vpop.f32.mrb[1].mxu1 }
 0x26d   :  { %588 = vmatmul.mubr.f32.vlgmr.msra.gmra.mrb[2].mxu0 %v263_v15 }
 0x340   :  { %v353_v21 = vpop.f32.mrb[2].mxu0 }
 0x341   :  { %v354_v22 = vadd.f32 %v478_v20, %v353_v21  ;;  %v589_v23 = vpop.f32.mrb[3].mxu0 }
 0x343   :  { %v357_v24 = vmax.f32 %v354_v22, 0.0 }
 0x345   :  { %623 = vmatmul.mubr.f32.vlgmr.msra.gmra.mrb[2].mxu1 %v357_v24 }
 0x418   :  { %v447_v25 = vpop.f32.mrb[2].mxu1 }
 0x419   :  { %v448_v26 = vadd.f32 %v479_v6, %v447_v25  ;;  %v624_v27 = vpop.f32.mrb[3].mxu1 }
 0x41b   :  { %v451_v28 = vmax.f32 %v448_v26, 0.0 }
 0x41d   :  { %452 = vst [vmem:[#allocation8] sm:$0xff] %v451_v28 }
 0x41e   :  { %779 = shalt.err (!%p776_p0)
}
 0x41f   :  { %s780_s11 = scalar_lea.hbm %s977_s8, 128 }
 0x420   :  { %p781_p1 = scmp.ne.s32.totalorder %s977_s8, %s780_s11  ;;  %p784_p2 = scmp.lt.u32.totalorder %s780_s11, %s977_s8 }
 0x422   :  { %p786_p3 = pnand %p784_p2, %p781_p1 }
 0x424   :  { %789 = shalt.err (!%p786_p3)
}
 0x425   :  { %462 = dma.vmem_to_hbm [thread:$0]  %s460_s28, 128, %s977_s8, [#allocation4]  }
 0x426   :  { %794 = dma.done.wait [#allocation4], 128  }
 0x427   :  { %795 = vsyncadd [#allocation4], 4294967168 }
 0x428   :  { %466 = vsyncpa [#allocation3], 1 }
 0x429   :  { %467 = vsyncpa [#allocation6], 1 }
 0x42a   :  { %468 = vsyncpa [#allocation4], 1 }

</bundles_post_ra>
